<compile_context>
chip_gen: v6e
topology: v6e:2x2x1
jax: 0.10.0
libtpu: 0.0.40
codegen_flags: <defaults>
</compile_context>

<pallas_src>
import functools

import jax
import jax.numpy as jnp
from jax.experimental import pallas as pl
from jax.experimental.pallas import tpu as pltpu


_LANE = 128
_VMEM_LIMIT = 32 * 1024 * 1024  # within v5e/v6e/v7x budgets; tiles use ~2 MiB


# ---------------------------------------------------------------------------
# small helpers
# ---------------------------------------------------------------------------
def _round_up(x, m):
    return ((x + m - 1) // m) * m


def _fit_tile(dim, pref):
    """Largest multiple of 128 <= pref that divides dim (dim is a 128-multiple)."""
    t = min(pref, dim)
    while dim % t != 0:
        t -= _LANE
    return t


def _pad2d(a, rows, cols, dtype):
    out = jnp.pad(a, ((0, rows - a.shape[0]), (0, cols - a.shape[1])))
    return out.astype(dtype)


# ---------------------------------------------------------------------------
# Pallas kernels
# ---------------------------------------------------------------------------
def _matmul_kernel(a_ref, b_ref, o_ref, acc_ref):
    """Tiled a @ b with f32 accumulator (bf16 inputs, MXU)."""
    @pl.when(pl.program_id(2) == 0)
    def _():
        acc_ref[...] = jnp.zeros_like(acc_ref)

    acc_ref[...] += jnp.dot(a_ref[...], b_ref[...],
                            preferred_element_type=jnp.float32)

    @pl.when(pl.program_id(2) == pl.num_programs(2) - 1)
    def _():
        o_ref[...] = acc_ref[...].astype(o_ref.dtype)


def _agg_epilogue_kernel(adj_ref, xw_ref, b_ref, o_ref, acc_ref, *,
                         epilogue, valid_cols):
    """Tiled adj_hat @ xw with fused bias + (ReLU | log_softmax) epilogue.

    For `log_softmax` the caller guarantees a single N-tile (tn == padded N),
    so column indices are a plain iota — no pl.program_id inside the pl.when
    body (program_id staged in a cond branch breaks the interpret fallback).
    """
    @pl.when(pl.program_id(2) == 0)
    def _():
        acc_ref[...] = jnp.zeros_like(acc_ref)

    acc_ref[...] += jnp.dot(adj_ref[...], xw_ref[...],
                            preferred_element_type=jnp.float32)

    @pl.when(pl.program_id(2) == pl.num_programs(2) - 1)
    def _():
        # Epilogue math kept in f32 (v5e VPU/EUP have no bf16).
        out = acc_ref[...] + b_ref[...].astype(jnp.float32)
        if epilogue == "relu":
            out = jnp.maximum(out, jnp.float32(0.0))
        elif epilogue == "log_softmax":
            # Mask lane-padding columns so they do not perturb the row softmax.
            col = jax.lax.broadcasted_iota(jnp.int32, out.shape, 1)
            out = jnp.where(col < valid_cols, out, jnp.float32(-1e30))
            m = jnp.max(out, axis=1, keepdims=True)
            shifted = out - m
            lse = jnp.log(jnp.sum(jnp.exp(shifted), axis=1, keepdims=True))
            out = shifted - lse
        o_ref[...] = out.astype(o_ref.dtype)


# ---------------------------------------------------------------------------
# pallas_call wrappers (grid + BlockSpecs + compiler params)
# ---------------------------------------------------------------------------
def _compiler_params():
    return pltpu.CompilerParams(
        dimension_semantics=("parallel", "parallel", "arbitrary"),
        vmem_limit_bytes=_VMEM_LIMIT)


def _tiled_matmul(a, b, *, out_dtype, tm=256, tn=256, tk=512):
    m, k = a.shape
    k2, n = b.shape
    assert k == k2 and m % _LANE == 0 and n % _LANE == 0 and k % _LANE == 0
    tm, tn, tk = _fit_tile(m, tm), _fit_tile(n, tn), _fit_tile(k, tk)
    grid = (m // tm, n // tn, k // tk)
    bytes_accessed = (a.size * a.dtype.itemsize + b.size * b.dtype.itemsize
                      + m * n * jnp.dtype(out_dtype).itemsize)
    return pl.pallas_call(
        _matmul_kernel,
        out_shape=jax.ShapeDtypeStruct((m, n), out_dtype),
        grid_spec=pltpu.PrefetchScalarGridSpec(
            num_scalar_prefetch=0,
            grid=grid,
            in_specs=[pl.BlockSpec((tm, tk), lambda i, j, kk: (i, kk)),
                      pl.BlockSpec((tk, tn), lambda i, j, kk: (kk, j))],
            out_specs=pl.BlockSpec((tm, tn), lambda i, j, kk: (i, j)),
            scratch_shapes=[pltpu.VMEM((tm, tn), jnp.float32)]),
        compiler_params=_compiler_params(),
        cost_estimate=pl.CostEstimate(
            flops=2 * m * n * k, transcendentals=0,
            bytes_accessed=bytes_accessed),
    )(a, b)


def _aggregate(adj, xw, bias, *, epilogue, valid_cols, out_dtype,
               tm=256, tn=256, tk=512):
    m, k = adj.shape
    k2, n = xw.shape
    assert k == k2 and m % _LANE == 0 and n % _LANE == 0 and k % _LANE == 0
    tm, tk = _fit_tile(m, tm), _fit_tile(k, tk)
    if epilogue == "log_softmax":
        tn = n  # full class row in one lane-dense tile so the reduction is local
    else:
        tn = _fit_tile(n, tn)
    grid = (m // tm, n // tn, k // tk)
    assert epilogue != "log_softmax" or grid[1] == 1
    kernel = functools.partial(_agg_epilogue_kernel, epilogue=epilogue,
                               valid_cols=valid_cols)
    bytes_accessed = (adj.size * adj.dtype.itemsize + xw.size * xw.dtype.itemsize
                      + bias.size * bias.dtype.itemsize
                      + m * n * jnp.dtype(out_dtype).itemsize)
    transcendentals = m * n if epilogue == "log_softmax" else 0
    return pl.pallas_call(
        kernel,
        out_shape=jax.ShapeDtypeStruct((m, n), out_dtype),
        grid_spec=pltpu.PrefetchScalarGridSpec(
            num_scalar_prefetch=0,
            grid=grid,
            in_specs=[pl.BlockSpec((tm, tk), lambda i, j, kk: (i, kk)),
                      pl.BlockSpec((tk, tn), lambda i, j, kk: (kk, j)),
                      pl.BlockSpec((1, tn), lambda i, j, kk: (0, j))],
            out_specs=pl.BlockSpec((tm, tn), lambda i, j, kk: (i, j)),
            scratch_shapes=[pltpu.VMEM((tm, tn), jnp.float32)]),
        compiler_params=_compiler_params(),
        cost_estimate=pl.CostEstimate(
            flops=2 * m * n * k, transcendentals=transcendentals,
            bytes_accessed=bytes_accessed),
    )(adj, xw, bias)


def gcn_layer(adj_p, x_p, w_p, b_p, *, epilogue, valid_cols, out_dtype):
    # stage 1: feature transform done once (not recomputed per adj row-tile)
    xw = _tiled_matmul(x_p, w_p, out_dtype=jnp.bfloat16)
    # stage 2: neighborhood aggregation with fused bias + epilogue
    return _aggregate(adj_p, xw, b_p, epilogue=epilogue,
                      valid_cols=valid_cols, out_dtype=out_dtype)


# ---------------------------------------------------------------------------
# Graph preprocessing: D^-1/2 (A + I) D^-1/2, PyG gcn_norm semantics.
# Static per graph -> built once, outside the jitted forward.
# ---------------------------------------------------------------------------
def normalized_adjacency(edge_index, num_nodes):
    src = edge_index[0]
    dst = edge_index[1]
    adj = jnp.zeros((num_nodes, num_nodes), dtype=jnp.float32)
    adj = adj.at[dst, src].add(1.0)                     # duplicate edges summed
    adj = adj + jnp.eye(num_nodes, dtype=jnp.float32)   # add self-loops
    deg = jnp.sum(adj, axis=1)                          # in-degree incl. self-loop
    dinv = jnp.where(deg > 0, jax.lax.rsqrt(deg), 0.0)
    return dinv[:, None] * adj * dinv[None, :]


# ---------------------------------------------------------------------------
# Model forward (inference mode: dropout is identity)
# ---------------------------------------------------------------------------
def custom_gnn_forward(params, feature_data, adj_hat):
    n, f_in = feature_data.shape
    hidden = params["w1"].shape[1]
    out_dim = params["w2"].shape[1]

    n_p = _round_up(n, _LANE)
    f_in_p = _round_up(f_in, _LANE)
    h_p = _round_up(hidden, _LANE)
    o_p = _round_up(out_dim, _LANE)

    # lane-dense, bf16 kernel inputs (f32 accumulation inside the kernels)
    adj_p = _pad2d(adj_hat, n_p, n_p, jnp.bfloat16)
    x_p = _pad2d(feature_data, n_p, f_in_p, jnp.bfloat16)
    w1_p = _pad2d(params["w1"], f_in_p, h_p, jnp.bfloat16)
    w2_p = _pad2d(params["w2"], h_p, o_p, jnp.bfloat16)
    b1_p = _pad2d(params["b1"].reshape(1, -1), 1, h_p, jnp.float32)
    b2_p = _pad2d(params["b2"].reshape(1, -1), 1, o_p, jnp.float32)

    # layer 1: GCNConv + bias + ReLU fused in the aggregation epilogue
    h = gcn_layer(adj_p, x_p, w1_p, b1_p, epilogue="relu",
                  valid_cols=hidden, out_dtype=jnp.bfloat16)
    # TODO(synk): F.dropout(p=0.5) is identity in eval mode; training-mode dropout
    # would use pltpu.prng_seed / pltpu.prng_random_bits inside the agg kernel.

    # layer 2: GCNConv + bias + log_softmax fused in the aggregation epilogue
    z = gcn_layer(adj_p, h, w2_p, b2_p, epilogue="log_softmax",
                  valid_cols=out_dim, out_dtype=jnp.float32)
    return z[:n, :out_dim]


def init_params(key, input_dim, hidden_dim, output_dim):
    k1, k2 = jax.random.split(key)
    scale1 = 1.0 / jnp.sqrt(jnp.float32(input_dim))
    scale2 = 1.0 / jnp.sqrt(jnp.float32(hidden_dim))
    return {
        "w1": jax.random.normal(k1, (input_dim, hidden_dim), jnp.float32) * scale1,
        "b1": jnp.zeros((hidden_dim,), jnp.float32),
        "w2": jax.random.normal(k2, (hidden_dim, output_dim), jnp.float32) * scale2,
        "b2": jnp.zeros((output_dim,), jnp.float32),
    }


if __name__ == "__main__":
    key = jax.random.PRNGKey(0)
    k_feat, k_edge, k_param = jax.random.split(key, 3)

    num_nodes = 32
    input_dim = 16
    hidden_dim = 32
    output_dim = 8
    num_edges = 64

    # Deterministic node features and random directed edges (plus a ring so the
    # graph is connected).
    feature_data = jax.random.normal(k_feat, (num_nodes, input_dim), jnp.float32)
    rand_edges = jax.random.randint(k_edge, (2, num_edges), 0, num_nodes, jnp.int32)
    ring_src = jnp.arange(num_nodes, dtype=jnp.int32)
    ring_dst = (ring_src + 1) % num_nodes
    ring = jnp.stack([ring_src, ring_dst], axis=0)
    edge_info = jnp.concatenate([rand_edges, ring], axis=1)  # [2, E]

    params = init_params(k_param, input_dim, hidden_dim, output_dim)

    # adjacency is static per graph: build it once, outside the jitted forward
    adj_hat = normalized_adjacency(edge_info, num_nodes)

    fwd = jax.jit(custom_gnn_forward)
    out = fwd(params, feature_data, adj_hat)
    jax.block_until_ready(out)

    assert out.shape == (num_nodes, output_dim)
    # rows of log_softmax must exp-sum to 1 (softmax is computed in f32)
    row_sums = jnp.sum(jnp.exp(out), axis=1)
    assert bool(jnp.all(jnp.abs(row_sums - 1.0) < 1e-3))
    print("KERNEL_OK")
</pallas_src>

<mosaic_0001>
module attributes {stable_mosaic.version = 11 : i64} {
  func.func @_matmul_kernel(%arg0: i32, %arg1: i32, %arg2: i32, %arg3: memref<128x128xbf16, #tpu.memory_space<vmem>>, %arg4: memref<128x128xbf16, #tpu.memory_space<vmem>>, %arg5: memref<128x128xbf16, #tpu.memory_space<vmem>>, %arg6: memref<128x128xf32, #tpu.memory_space<vmem>>) attributes {dimension_semantics = [#tpu.dimension_semantics<parallel>, #tpu.dimension_semantics<parallel>, #tpu.dimension_semantics<arbitrary>], iteration_bounds = array<i64: 1, 1, 1>, scalar_prefetch = 0 : i64, scratch_operands = 1 : i64, tpu.core_type = #tpu.core_type<tc>, window_params = [{transform_indices = @transform_0, window_bounds = array<i64: 128, 128>}, {transform_indices = @transform_1, window_bounds = array<i64: 128, 128>}, {transform_indices = @transform_2, window_bounds = array<i64: 128, 128>}]} {
    %c0_i32 = arith.constant 0 : i32
    %0 = arith.cmpi eq, %arg2, %c0_i32 : i32
    %1 = arith.extui %0 : i1 to i32
    %c0_i32_0 = arith.constant 0 : i32
    %2 = arith.cmpi ne, %1, %c0_i32_0 : i32
    scf.if %2 {
      %cst_10 = arith.constant 0.000000e+00 : f32
      %12 = vector.broadcast %cst_10 : f32 to vector<128x128xf32>
      %c0_11 = arith.constant 0 : index
      %c0_12 = arith.constant 0 : index
      %13 = vector.load %arg6[%c0_11, %c0_12] : memref<128x128xf32, #tpu.memory_space<vmem>>, vector<128x128xf32>
      tpu.vector_store %arg6[%c0_11, %c0_12], %12 {strides = array<i32>} : memref<128x128xf32, #tpu.memory_space<vmem>>, vector<128x128xf32>,
    } else {
    }
    %c0 = arith.constant 0 : index
    %c0_1 = arith.constant 0 : index
    %3 = vector.load %arg6[%c0, %c0_1] : memref<128x128xf32, #tpu.memory_space<vmem>>, vector<128x128xf32>
    %c0_2 = arith.constant 0 : index
    %c0_3 = arith.constant 0 : index
    %4 = vector.load %arg3[%c0_2, %c0_3] : memref<128x128xbf16, #tpu.memory_space<vmem>>, vector<128x128xbf16>
    %c0_4 = arith.constant 0 : index
    %c0_5 = arith.constant 0 : index
    %5 = vector.load %arg4[%c0_4, %c0_5] : memref<128x128xbf16, #tpu.memory_space<vmem>>, vector<128x128xbf16>
    %cst = arith.constant dense<0.000000e+00> : vector<128x128xf32>
    %6 = tpu.matmul %4, %5, %cst {dimension_numbers = #tpu.dot_dimension_numbers<[1], [0], [0], [1], [0, 0, 1, 1], [], []>} : vector<128x128xbf16>, vector<128x128xbf16>, vector<128x128xf32> -> vector<128x128xf32>
    %7 = arith.addf %3, %6 : vector<128x128xf32>
    %c0_6 = arith.constant 0 : index
    %c0_7 = arith.constant 0 : index
    %8 = vector.load %arg6[%c0_6, %c0_7] : memref<128x128xf32, #tpu.memory_space<vmem>>, vector<128x128xf32>
    tpu.vector_store %arg6[%c0_6, %c0_7], %7 {strides = array<i32>} : memref<128x128xf32, #tpu.memory_space<vmem>>, vector<128x128xf32>,
    %c0_i32_8 = arith.constant 0 : i32
    %9 = arith.cmpi eq, %arg2, %c0_i32_8 : i32
    %10 = arith.extui %9 : i1 to i32
    %c0_i32_9 = arith.constant 0 : i32
    %11 = arith.cmpi ne, %10, %c0_i32_9 : i32
    scf.if %11 {
      %c0_10 = arith.constant 0 : index
      %c0_11 = arith.constant 0 : index
      %12 = vector.load %arg6[%c0_10, %c0_11] : memref<128x128xf32, #tpu.memory_space<vmem>>, vector<128x128xf32>
      %13 = arith.truncf %12 : vector<128x128xf32> to vector<128x128xbf16>
      %c0_12 = arith.constant 0 : index
      %c0_13 = arith.constant 0 : index
      %14 = vector.load %arg5[%c0_12, %c0_13] : memref<128x128xbf16, #tpu.memory_space<vmem>>, vector<128x128xbf16>
      tpu.vector_store %arg5[%c0_12, %c0_13], %13 {strides = array<i32>} : memref<128x128xbf16, #tpu.memory_space<vmem>>, vector<128x128xbf16>,
    } else {
    }
    return
  }
  func.func @transform_0(%arg0: i32, %arg1: i32, %arg2: i32) -> (i32, i32) {
    %c0_i32 = arith.constant 0 : i32
    return %arg0, %arg2 : i32, i32
  }
  func.func @transform_1(%arg0: i32, %arg1: i32, %arg2: i32) -> (i32, i32) {
    %c0_i32 = arith.constant 0 : i32
    return %arg2, %arg1 : i32, i32
  }
  func.func @transform_2(%arg0: i32, %arg1: i32, %arg2: i32) -> (i32, i32) {
    %c0_i32 = arith.constant 0 : i32
    return %arg0, %arg1 : i32, i32
  }
}

module attributes {stable_mosaic.version = 11 : i64} {
  func.func @_agg_epilogue_kernel(%arg0: i32, %arg1: i32, %arg2: i32, %arg3: memref<128x128xbf16, #tpu.memory_space<vmem>>, %arg4: memref<128x128xbf16, #tpu.memory_space<vmem>>, %arg5: memref<1x128xf32, #tpu.memory_space<vmem>>, %arg6: memref<128x128xbf16, #tpu.memory_space<vmem>>, %arg7: memref<128x128xf32, #tpu.memory_space<vmem>>) attributes {dimension_semantics = [#tpu.dimension_semantics<parallel>, #tpu.dimension_semantics<parallel>, #tpu.dimension_semantics<arbitrary>], iteration_bounds = array<i64: 1, 1, 1>, scalar_prefetch = 0 : i64, scratch_operands = 1 : i64, tpu.core_type = #tpu.core_type<tc>, window_params = [{transform_indices = @transform_0, window_bounds = array<i64: 128, 128>}, {transform_indices = @transform_1, window_bounds = array<i64: 128, 128>}, {transform_indices = @transform_2, window_bounds = array<i64: 1, 128>}, {transform_indices = @transform_3, window_bounds = array<i64: 128, 128>}]} {
    %c0_i32 = arith.constant 0 : i32
    %0 = arith.cmpi eq, %arg2, %c0_i32 : i32
    %1 = arith.extui %0 : i1 to i32
    %c0_i32_0 = arith.constant 0 : i32
    %2 = arith.cmpi ne, %1, %c0_i32_0 : i32
    scf.if %2 {
      %cst_10 = arith.constant 0.000000e+00 : f32
      %12 = vector.broadcast %cst_10 : f32 to vector<128x128xf32>
      %c0_11 = arith.constant 0 : index
      %c0_12 = arith.constant 0 : index
      %13 = vector.load %arg7[%c0_11, %c0_12] : memref<128x128xf32, #tpu.memory_space<vmem>>, vector<128x128xf32>
      tpu.vector_store %arg7[%c0_11, %c0_12], %12 {strides = array<i32>} : memref<128x128xf32, #tpu.memory_space<vmem>>, vector<128x128xf32>,
    } else {
    }
    %c0 = arith.constant 0 : index
    %c0_1 = arith.constant 0 : index
    %3 = vector.load %arg7[%c0, %c0_1] : memref<128x128xf32, #tpu.memory_space<vmem>>, vector<128x128xf32>
    %c0_2 = arith.constant 0 : index
    %c0_3 = arith.constant 0 : index
    %4 = vector.load %arg3[%c0_2, %c0_3] : memref<128x128xbf16, #tpu.memory_space<vmem>>, vector<128x128xbf16>
    %c0_4 = arith.constant 0 : index
    %c0_5 = arith.constant 0 : index
    %5 = vector.load %arg4[%c0_4, %c0_5] : memref<128x128xbf16, #tpu.memory_space<vmem>>, vector<128x128xbf16>
    %cst = arith.constant dense<0.000000e+00> : vector<128x128xf32>
    %6 = tpu.matmul %4, %5, %cst {dimension_numbers = #tpu.dot_dimension_numbers<[1], [0], [0], [1], [0, 0, 1, 1], [], []>} : vector<128x128xbf16>, vector<128x128xbf16>, vector<128x128xf32> -> vector<128x128xf32>
    %7 = arith.addf %3, %6 : vector<128x128xf32>
    %c0_6 = arith.constant 0 : index
    %c0_7 = arith.constant 0 : index
    %8 = vector.load %arg7[%c0_6, %c0_7] : memref<128x128xf32, #tpu.memory_space<vmem>>, vector<128x128xf32>
    tpu.vector_store %arg7[%c0_6, %c0_7], %7 {strides = array<i32>} : memref<128x128xf32, #tpu.memory_space<vmem>>, vector<128x128xf32>,
    %c0_i32_8 = arith.constant 0 : i32
    %9 = arith.cmpi eq, %arg2, %c0_i32_8 : i32
    %10 = arith.extui %9 : i1 to i32
    %c0_i32_9 = arith.constant 0 : i32
    %11 = arith.cmpi ne, %10, %c0_i32_9 : i32
    scf.if %11 {
      %c0_10 = arith.constant 0 : index
      %c0_11 = arith.constant 0 : index
      %12 = vector.load %arg7[%c0_10, %c0_11] : memref<128x128xf32, #tpu.memory_space<vmem>>, vector<128x128xf32>
      %c0_12 = arith.constant 0 : index
      %c0_13 = arith.constant 0 : index
      %13 = vector.load %arg5[%c0_12, %c0_13] : memref<1x128xf32, #tpu.memory_space<vmem>>, vector<1x128xf32>
      %14 = vector.broadcast %13 : vector<1x128xf32> to vector<128x128xf32>
      %15 = arith.addf %12, %14 : vector<128x128xf32>
      %cst_14 = arith.constant 0.000000e+00 : f32
      %16 = vector.broadcast %cst_14 : f32 to vector<128x128xf32>
      %17 = arith.maximumf %15, %16 : vector<128x128xf32>
      %18 = arith.truncf %17 : vector<128x128xf32> to vector<128x128xbf16>
      %c0_15 = arith.constant 0 : index
      %c0_16 = arith.constant 0 : index
      %19 = vector.load %arg6[%c0_15, %c0_16] : memref<128x128xbf16, #tpu.memory_space<vmem>>, vector<128x128xbf16>
      tpu.vector_store %arg6[%c0_15, %c0_16], %18 {strides = array<i32>} : memref<128x128xbf16, #tpu.memory_space<vmem>>, vector<128x128xbf16>,
    } else {
    }
    return
  }
  func.func @transform_0(%arg0: i32, %arg1: i32, %arg2: i32) -> (i32, i32) {
    %c0_i32 = arith.constant 0 : i32
    return %arg0, %arg2 : i32, i32
  }
  func.func @transform_1(%arg0: i32, %arg1: i32, %arg2: i32) -> (i32, i32) {
    %c0_i32 = arith.constant 0 : i32
    return %arg2, %arg1 : i32, i32
  }
  func.func @transform_2(%arg0: i32, %arg1: i32, %arg2: i32) -> (i32, i32) {
    %c0_i32 = arith.constant 0 : i32
    %c0_i32_0 = arith.constant 0 : i32
    return %c0_i32, %arg1 : i32, i32
  }
  func.func @transform_3(%arg0: i32, %arg1: i32, %arg2: i32) -> (i32, i32) {
    %c0_i32 = arith.constant 0 : i32
    return %arg0, %arg1 : i32, i32
  }
}

module attributes {stable_mosaic.version = 11 : i64} {
  func.func @_agg_epilogue_kernel(%arg0: i32, %arg1: i32, %arg2: i32, %arg3: memref<128x128xbf16, #tpu.memory_space<vmem>>, %arg4: memref<128x128xbf16, #tpu.memory_space<vmem>>, %arg5: memref<1x128xf32, #tpu.memory_space<vmem>>, %arg6: memref<128x128xf32, #tpu.memory_space<vmem>>, %arg7: memref<128x128xf32, #tpu.memory_space<vmem>>) attributes {dimension_semantics = [#tpu.dimension_semantics<parallel>, #tpu.dimension_semantics<parallel>, #tpu.dimension_semantics<arbitrary>], iteration_bounds = array<i64: 1, 1, 1>, scalar_prefetch = 0 : i64, scratch_operands = 1 : i64, tpu.core_type = #tpu.core_type<tc>, window_params = [{transform_indices = @transform_0, window_bounds = array<i64: 128, 128>}, {transform_indices = @transform_1, window_bounds = array<i64: 128, 128>}, {transform_indices = @transform_2, window_bounds = array<i64: 1, 128>}, {transform_indices = @transform_3, window_bounds = array<i64: 128, 128>}]} {
    %c0_i32 = arith.constant 0 : i32
    %0 = arith.cmpi eq, %arg2, %c0_i32 : i32
    %1 = arith.extui %0 : i1 to i32
    %c0_i32_0 = arith.constant 0 : i32
    %2 = arith.cmpi ne, %1, %c0_i32_0 : i32
    scf.if %2 {
      %cst_10 = arith.constant 0.000000e+00 : f32
      %12 = vector.broadcast %cst_10 : f32 to vector<128x128xf32>
      %c0_11 = arith.constant 0 : index
      %c0_12 = arith.constant 0 : index
      %13 = vector.load %arg7[%c0_11, %c0_12] : memref<128x128xf32, #tpu.memory_space<vmem>>, vector<128x128xf32>
      tpu.vector_store %arg7[%c0_11, %c0_12], %12 {strides = array<i32>} : memref<128x128xf32, #tpu.memory_space<vmem>>, vector<128x128xf32>,
    } else {
    }
    %c0 = arith.constant 0 : index
    %c0_1 = arith.constant 0 : index
    %3 = vector.load %arg7[%c0, %c0_1] : memref<128x128xf32, #tpu.memory_space<vmem>>, vector<128x128xf32>
    %c0_2 = arith.constant 0 : index
    %c0_3 = arith.constant 0 : index
    %4 = vector.load %arg3[%c0_2, %c0_3] : memref<128x128xbf16, #tpu.memory_space<vmem>>, vector<128x128xbf16>
    %c0_4 = arith.constant 0 : index
    %c0_5 = arith.constant 0 : index
    %5 = vector.load %arg4[%c0_4, %c0_5] : memref<128x128xbf16, #tpu.memory_space<vmem>>, vector<128x128xbf16>
    %cst = arith.constant dense<0.000000e+00> : vector<128x128xf32>
    %6 = tpu.matmul %4, %5, %cst {dimension_numbers = #tpu.dot_dimension_numbers<[1], [0], [0], [1], [0, 0, 1, 1], [], []>} : vector<128x128xbf16>, vector<128x128xbf16>, vector<128x128xf32> -> vector<128x128xf32>
    %7 = arith.addf %3, %6 : vector<128x128xf32>
    %c0_6 = arith.constant 0 : index
    %c0_7 = arith.constant 0 : index
    %8 = vector.load %arg7[%c0_6, %c0_7] : memref<128x128xf32, #tpu.memory_space<vmem>>, vector<128x128xf32>
    tpu.vector_store %arg7[%c0_6, %c0_7], %7 {strides = array<i32>} : memref<128x128xf32, #tpu.memory_space<vmem>>, vector<128x128xf32>,
    %c0_i32_8 = arith.constant 0 : i32
    %9 = arith.cmpi eq, %arg2, %c0_i32_8 : i32
    %10 = arith.extui %9 : i1 to i32
    %c0_i32_9 = arith.constant 0 : i32
    %11 = arith.cmpi ne, %10, %c0_i32_9 : i32
    scf.if %11 {
      %c0_10 = arith.constant 0 : index
      %c0_11 = arith.constant 0 : index
      %12 = vector.load %arg7[%c0_10, %c0_11] : memref<128x128xf32, #tpu.memory_space<vmem>>, vector<128x128xf32>
      %c0_12 = arith.constant 0 : index
      %c0_13 = arith.constant 0 : index
      %13 = vector.load %arg5[%c0_12, %c0_13] : memref<1x128xf32, #tpu.memory_space<vmem>>, vector<1x128xf32>
      %14 = vector.broadcast %13 : vector<1x128xf32> to vector<128x128xf32>
      %15 = arith.addf %12, %14 : vector<128x128xf32>
      %16 = tpu.iota {dimensions = array<i32: 1>} : vector<128x128xi32>
      %c8_i32 = arith.constant 8 : i32
      %17 = vector.broadcast %c8_i32 : i32 to vector<128x128xi32>
      %18 = arith.cmpi slt, %16, %17 : vector<128x128xi32>
      %cst_14 = arith.constant -1.000000e+30 : f32
      %19 = vector.broadcast %cst_14 : f32 to vector<128x128xf32>
      %20 = arith.select %18, %15, %19 : vector<128x128xi1>, vector<128x128xf32>
      %cst_15 = arith.constant dense<0xFF800000> : vector<128xf32>
      %21 = vector.multi_reduction <maximumf>, %20, %cst_15 [1] : vector<128x128xf32> to vector<128xf32>
      %22 = vector.shape_cast %21 : vector<128xf32> to vector<128x1xf32>
      %23 = vector.broadcast %22 : vector<128x1xf32> to vector<128x128xf32>
      %24 = arith.subf %20, %23 : vector<128x128xf32>
      %25 = math.exp %24 : vector<128x128xf32>
      %cst_16 = arith.constant dense<0.000000e+00> : vector<128xf32>
      %26 = vector.multi_reduction <add>, %25, %cst_16 [1] : vector<128x128xf32> to vector<128xf32>
      %27 = vector.shape_cast %26 : vector<128xf32> to vector<128x1xf32>
      %28 = math.log %27 : vector<128x1xf32>
      %29 = vector.broadcast %28 : vector<128x1xf32> to vector<128x128xf32>
      %30 = arith.subf %24, %29 : vector<128x128xf32>
      %c0_17 = arith.constant 0 : index
      %c0_18 = arith.constant 0 : index
      %31 = vector.load %arg6[%c0_17, %c0_18] : memref<128x128xf32, #tpu.memory_space<vmem>>, vector<128x128xf32>
      tpu.vector_store %arg6[%c0_17, %c0_18], %30 {strides = array<i32>} : memref<128x128xf32, #tpu.memory_space<vmem>>, vector<128x128xf32>,
    } else {
    }
    return
  }
  func.func @transform_0(%arg0: i32, %arg1: i32, %arg2: i32) -> (i32, i32) {
    %c0_i32 = arith.constant 0 : i32
    return %arg0, %arg2 : i32, i32
  }
  func.func @transform_1(%arg0: i32, %arg1: i32, %arg2: i32) -> (i32, i32) {
    %c0_i32 = arith.constant 0 : i32
    return %arg2, %arg1 : i32, i32
  }
  func.func @transform_2(%arg0: i32, %arg1: i32, %arg2: i32) -> (i32, i32) {
    %c0_i32 = arith.constant 0 : i32
    %c0_i32_0 = arith.constant 0 : i32
    return %c0_i32, %arg1 : i32, i32
  }
  func.func @transform_3(%arg0: i32, %arg1: i32, %arg2: i32) -> (i32, i32) {
    %c0_i32 = arith.constant 0 : i32
    return %arg0, %arg1 : i32, i32
  }
}

</mosaic_0001>

<bundles_post_ra>
// kernel: custom_gnn_forward.4
= control target key start
LH: loop header
LB: loop body
LE: loop exit
PB: predicated region body
PF: predicated region fallthrough
CT: control target
= control target key end

     0   :  { %s670_s1 = inlined_call_operand.vmem [shape: bf16[128,128], index: 1, kind: input, shape index: {}]   ;;  %s671_s0 = inlined_call_operand.vmem [shape: bf16[128,128], index: 0, kind: input, shape index: {}]   ;;  %s672_s2 = inlined_call_operand.vmem [shape: bf16[128,128], index: 2, kind: output, shape index: {}]  }
   0x1   :  { %v567_v0 = vld [vmem:[%s670_s1 + $0x38] sm:$0xff]   ;;  %v568_v1 = vld [vmem:[%s670_s1 + $0x30] sm:$0xff]   ;;  %v569_v2 = vld [vmem:[%s670_s1 + $0x28] sm:$0xff]  }
   0x2   :  { %519 = vmatprep.subr.bf16.mxu0 %v567_v0  ;;  %551 = vmatprep.subr.bf16.mxu1 %v567_v0  ;;  %v570_v3 = vld [vmem:[%s670_s1 + $0x20] sm:$0xff]   ;;  %v571_v6 = vld [vmem:[%s670_s1 + $0x18] sm:$0xff]   ;;  %v572_v7 = vld [vmem:[%s670_s1 + $0x10] sm:$0xff]  }
   0x3   :  { %520 = vmatpush3.bf16.msra.mxu0 %v567_v0  ;;  %559 = vmatpush3.bf16.msra.mxu1 %v567_v0  ;;  %v575_v4 = vld [vmem:[%s671_s0] sm:$0xff]   ;;  %v573_v8 = vld [vmem:[%s670_s1 + $0x8] sm:$0xff]   ;;  %v579_v12 = vld [vmem:[%s671_s0 + $0x10] sm:$0xff]  }
   0x4   :  { %521 = vmatprep.subr.bf16.mxu0 %v568_v1  ;;  %552 = vmatprep.subr.bf16.mxu1 %v568_v1  ;;  %v576_v5 = vld [vmem:[%s671_s0 + $0x20] sm:$0xff]   ;;  %v577_v10 = vld [vmem:[%s671_s0 + $0x8] sm:$0xff]   ;;  %v580_v13 = vld [vmem:[%s671_s0 + $0x30] sm:$0xff]  }
   0x5   :  { %535 = vmatprep.mubr.bf16.mxu0 %v575_v4  ;;  %543 = vmatprep.mubr.bf16.mxu1 %v576_v5  ;;  %v574_v9 = vld [vmem:[%s670_s1] sm:$0xff]   ;;  %v578_v11 = vld [vmem:[%s671_s0 + $0x28] sm:$0xff]   ;;  %v581_v14 = vld [vmem:[%s671_s0 + $0x18] sm:$0xff]  }
   0x6   :  { %v582_v15 = vld [vmem:[%s671_s0 + $0x38] sm:$0xff]  }
   0x7   :  { %522 = vmatpush3.bf16.msra.mxu0 %v568_v1  ;;  %560 = vmatpush3.bf16.msra.mxu1 %v568_v1 }
   0x8   :  { %523 = vmatprep.subr.bf16.mxu0 %v569_v2  ;;  %553 = vmatprep.subr.bf16.mxu1 %v569_v2 }
   0xb   :  { %524 = vmatpush3.bf16.msra.mxu0 %v569_v2  ;;  %561 = vmatpush3.bf16.msra.mxu1 %v569_v2 }
   0xc   :  { %525 = vmatprep.subr.bf16.mxu0 %v570_v3  ;;  %554 = vmatprep.subr.bf16.mxu1 %v570_v3 }
   0xf   :  { %526 = vmatpush3.bf16.msra.mxu0 %v570_v3  ;;  %562 = vmatpush3.bf16.msra.mxu1 %v570_v3 }
  0x10   :  { %527 = vmatprep.subr.bf16.mxu0 %v571_v6  ;;  %555 = vmatprep.subr.bf16.mxu1 %v571_v6 }
  0x13   :  { %528 = vmatpush3.bf16.msra.mxu0 %v571_v6  ;;  %563 = vmatpush3.bf16.msra.mxu1 %v571_v6 }
  0x14   :  { %529 = vmatprep.subr.bf16.mxu0 %v572_v7  ;;  %556 = vmatprep.subr.bf16.mxu1 %v572_v7 }
  0x17   :  { %530 = vmatpush3.bf16.msra.mxu0 %v572_v7  ;;  %564 = vmatpush3.bf16.msra.mxu1 %v572_v7 }
  0x18   :  { %531 = vmatprep.subr.bf16.mxu0 %v573_v8  ;;  %557 = vmatprep.subr.bf16.mxu1 %v573_v8 }
  0x1b   :  { %532 = vmatpush3.bf16.msra.mxu0 %v573_v8  ;;  %565 = vmatpush3.bf16.msra.mxu1 %v573_v8 }
  0x1c   :  { %533 = vmatprep.subr.bf16.mxu0 %v574_v9  ;;  %558 = vmatprep.subr.bf16.mxu1 %v574_v9 }
  0x1f   :  { %534 = vmatpush3.bf16.msra.mxu0 %v574_v9  ;;  %566 = vmatpush3.bf16.msra.mxu1 %v574_v9 }
  0x22   :  { %536 = vmatmul.mubr.bf16.vlgmr.msra.gmra.mxu0 %v577_v10  ;;  %544 = vmatmul.mubr.bf16.vlgmr.msra.gmra.mxu1 %v578_v11 }
  0x23   :  { %539 = vmatprep.mubr.bf16.mxu0 %v579_v12  ;;  %547 = vmatprep.mubr.bf16.mxu1 %v580_v13 }
  0x2a   :  { %540 = vmatmul.mubr.bf16.gmra.mxu0 %v581_v14  ;;  %548 = vmatmul.mubr.bf16.gmra.mxu1 %v582_v15 }
  0xe2   :  { %v537_v16 = vpop.f32.mrf.mxu0  ;;  %v545_v17 = vpop.f32.mrf.mxu1 }
  0xe4   :  { %v210_v18 = vpop.f32.mrf.mxu0  ;;  %v242_v19 = vpop.f32.mrf.mxu1 }
  0xe6   :  { %v538_v20 = vpop.f32.mrf.mxu0  ;;  %v546_v21 = vpop.f32.mrf.mxu1 }
  0xe7   :  { %v464_v22 = vpack.c.bf16 %v538_v20, %v537_v16  ;;  %v484_v23 = vpack.c.bf16 %v546_v21, %v545_v17 }
  0xe8   :  { %v213_v24 = vpop.f32.mrf.mxu0  ;;  %v245_v25 = vpop.f32.mrf.mxu1 }
  0xe9   :  { %496 = vst [vmem:[%s672_s2 + $0x8] sm:$0xff] %v464_v22   ;;  %500 = vst [vmem:[%s672_s2 + $0x28] sm:$0xff] %v484_v23   ;;  %v459_v26 = vpack.c.bf16 %v213_v24, %v210_v18  ;;  %v479_v27 = vpack.c.bf16 %v245_v25, %v242_v19 }
  0xea   :  { %v541_v28 = vpop.f32.mrf.mxu0  ;;  %v549_v29 = vpop.f32.mrf.mxu1 }
  0xeb   :  { %460 = vst [vmem:[%s672_s2] sm:$0xff] %v459_v26   ;;  %499 = vst [vmem:[%s672_s2 + $0x20] sm:$0xff] %v479_v27  }
  0xec   :  { %v226_v30 = vpop.f32.mrf.mxu0  ;;  %v258_v31 = vpop.f32.mrf.mxu1 }
  0xee   :  { %v542_v32 = vpop.f32.mrf.mxu0  ;;  %v550_v33 = vpop.f32.mrf.mxu1 }
  0xef   :  { %v474_v34 = vpack.c.bf16 %v542_v32, %v541_v28  ;;  %v494_v35 = vpack.c.bf16 %v550_v33, %v549_v29 }
  0xf0   :  { %v229_v36 = vpop.f32.mrf.mxu0  ;;  %v261_v37 = vpop.f32.mrf.mxu1 }
  0xf1   :  { %498 = vst [vmem:[%s672_s2 + $0x18] sm:$0xff] %v474_v34   ;;  %502 = vst [vmem:[%s672_s2 + $0x38] sm:$0xff] %v494_v35   ;;  %v469_v38 = vpack.c.bf16 %v229_v36, %v226_v30  ;;  %v489_v39 = vpack.c.bf16 %v261_v37, %v258_v31 }
  0xf3   :  { %497 = vst [vmem:[%s672_s2 + $0x10] sm:$0xff] %v469_v38   ;;  %501 = vst [vmem:[%s672_s2 + $0x30] sm:$0xff] %v489_v39  }

// kernel: custom_gnn_forward.5
= control target key start
LH: loop header
LB: loop body
LE: loop exit
PB: predicated region body
PF: predicated region fallthrough
CT: control target
= control target key end

     0   :  { %s721_s1 = inlined_call_operand.vmem [shape: bf16[128,128], index: 1, kind: input, shape index: {}]   ;;  %s722_s0 = inlined_call_operand.vmem [shape: bf16[128,128], index: 0, kind: input, shape index: {}]   ;;  %s723_s2 = inlined_call_operand.vmem [shape: f32[1,128], index: 2, kind: input, shape index: {}]   ;;  %s724_s3 = inlined_call_operand.vmem [shape: bf16[128,128], index: 3, kind: output, shape index: {}]  }
   0x1   :  { %v610_v0 = vld [vmem:[%s721_s1 + $0x38] sm:$0xff]   ;;  %v611_v1 = vld [vmem:[%s721_s1 + $0x30] sm:$0xff]   ;;  %v612_v2 = vld [vmem:[%s721_s1 + $0x28] sm:$0xff]  }
   0x2   :  { %562 = vmatprep.subr.bf16.mxu0 %v610_v0  ;;  %594 = vmatprep.subr.bf16.mxu1 %v610_v0  ;;  %v613_v3 = vld [vmem:[%s721_s1 + $0x20] sm:$0xff]   ;;  %v614_v6 = vld [vmem:[%s721_s1 + $0x18] sm:$0xff]   ;;  %v615_v7 = vld [vmem:[%s721_s1 + $0x10] sm:$0xff]  }
   0x3   :  { %563 = vmatpush3.bf16.msra.mxu0 %v610_v0  ;;  %602 = vmatpush3.bf16.msra.mxu1 %v610_v0  ;;  %v618_v4 = vld [vmem:[%s722_s0] sm:$0xff]   ;;  %v616_v8 = vld [vmem:[%s721_s1 + $0x8] sm:$0xff]   ;;  %v622_v12 = vld [vmem:[%s722_s0 + $0x10] sm:$0xff]  }
   0x4   :  { %564 = vmatprep.subr.bf16.mxu0 %v611_v1  ;;  %595 = vmatprep.subr.bf16.mxu1 %v611_v1  ;;  %v619_v5 = vld [vmem:[%s722_s0 + $0x20] sm:$0xff]   ;;  %v620_v10 = vld [vmem:[%s722_s0 + $0x8] sm:$0xff]   ;;  %v623_v13 = vld [vmem:[%s722_s0 + $0x30] sm:$0xff]  }
   0x5   :  { %578 = vmatprep.mubr.bf16.mxu0 %v618_v4  ;;  %586 = vmatprep.mubr.bf16.mxu1 %v619_v5  ;;  %v617_v9 = vld [vmem:[%s721_s1] sm:$0xff]   ;;  %v621_v11 = vld [vmem:[%s722_s0 + $0x28] sm:$0xff]   ;;  %v624_v14 = vld [vmem:[%s722_s0 + $0x18] sm:$0xff]  }
   0x6   :  { %v625_v15 = vld [vmem:[%s722_s0 + $0x38] sm:$0xff]   ;;  %v466_v16 = vld [vmem:[%s723_s2] ss:$0 sm:$0xff] }
   0x7   :  { %565 = vmatpush3.bf16.msra.mxu0 %v611_v1  ;;  %603 = vmatpush3.bf16.msra.mxu1 %v611_v1 }
   0x8   :  { %566 = vmatprep.subr.bf16.mxu0 %v612_v2  ;;  %596 = vmatprep.subr.bf16.mxu1 %v612_v2 }
   0xb   :  { %567 = vmatpush3.bf16.msra.mxu0 %v612_v2  ;;  %604 = vmatpush3.bf16.msra.mxu1 %v612_v2 }
   0xc   :  { %568 = vmatprep.subr.bf16.mxu0 %v613_v3  ;;  %597 = vmatprep.subr.bf16.mxu1 %v613_v3 }
   0xf   :  { %569 = vmatpush3.bf16.msra.mxu0 %v613_v3  ;;  %605 = vmatpush3.bf16.msra.mxu1 %v613_v3 }
  0x10   :  { %570 = vmatprep.subr.bf16.mxu0 %v614_v6  ;;  %598 = vmatprep.subr.bf16.mxu1 %v614_v6 }
  0x13   :  { %571 = vmatpush3.bf16.msra.mxu0 %v614_v6  ;;  %606 = vmatpush3.bf16.msra.mxu1 %v614_v6 }
  0x14   :  { %572 = vmatprep.subr.bf16.mxu0 %v615_v7  ;;  %599 = vmatprep.subr.bf16.mxu1 %v615_v7 }
  0x17   :  { %573 = vmatpush3.bf16.msra.mxu0 %v615_v7  ;;  %607 = vmatpush3.bf16.msra.mxu1 %v615_v7 }
  0x18   :  { %574 = vmatprep.subr.bf16.mxu0 %v616_v8  ;;  %600 = vmatprep.subr.bf16.mxu1 %v616_v8 }
  0x1b   :  { %575 = vmatpush3.bf16.msra.mxu0 %v616_v8  ;;  %608 = vmatpush3.bf16.msra.mxu1 %v616_v8 }
  0x1c   :  { %576 = vmatprep.subr.bf16.mxu0 %v617_v9  ;;  %601 = vmatprep.subr.bf16.mxu1 %v617_v9 }
  0x1f   :  { %577 = vmatpush3.bf16.msra.mxu0 %v617_v9  ;;  %609 = vmatpush3.bf16.msra.mxu1 %v617_v9 }
  0x22   :  { %579 = vmatmul.mubr.bf16.vlgmr.msra.gmra.mxu0 %v620_v10  ;;  %587 = vmatmul.mubr.bf16.vlgmr.msra.gmra.mxu1 %v621_v11 }
  0x23   :  { %582 = vmatprep.mubr.bf16.mxu0 %v622_v12  ;;  %590 = vmatprep.mubr.bf16.mxu1 %v623_v13 }
  0x2a   :  { %583 = vmatmul.mubr.bf16.gmra.mxu0 %v624_v14  ;;  %591 = vmatmul.mubr.bf16.gmra.mxu1 %v625_v15 }
  0xe2   :  { %v580_v17 = vpop.f32.mrf.mxu0  ;;  %v588_v18 = vpop.f32.mrf.mxu1 }
  0xe3   :  { %v336_v19 = vadd.f32 %v580_v17, %v466_v16  ;;  %v344_v20 = vadd.f32 %v588_v18, %v466_v16 }
  0xe4   :  { %v213_v21 = vpop.f32.mrf.mxu0  ;;  %v245_v22 = vpop.f32.mrf.mxu1 }
  0xe5   :  { %v334_v23 = vadd.f32 %v466_v16, %v213_v21  ;;  %v342_v24 = vadd.f32 %v466_v16, %v245_v22  ;;  %v352_v29 = vmax.f32 %v336_v19, 0.0  ;;  %v360_v30 = vmax.f32 %v344_v20, 0.0 }
  0xe6   :  { %v581_v25 = vpop.f32.mrf.mxu0  ;;  %v589_v26 = vpop.f32.mrf.mxu1 }
  0xe7   :  { %v337_v27 = vadd.f32 %v581_v25, %v466_v16  ;;  %v345_v28 = vadd.f32 %v589_v26, %v466_v16  ;;  %v350_v37 = vmax.f32 %v334_v23, 0.0  ;;  %v358_v38 = vmax.f32 %v342_v24, 0.0 }
  0xe8   :  { %v216_v31 = vpop.f32.mrf.mxu0  ;;  %v248_v32 = vpop.f32.mrf.mxu1 }
  0xe9   :  { %v353_v33 = vmax.f32 %v337_v27, 0.0  ;;  %v361_v34 = vmax.f32 %v345_v28, 0.0  ;;  %v335_v35 = vadd.f32 %v466_v16, %v216_v31  ;;  %v343_v36 = vadd.f32 %v466_v16, %v248_v32 }
  0xea   :  { %v584_v39 = vpop.f32.mrf.mxu0  ;;  %v592_v40 = vpop.f32.mrf.mxu1 }
  0xeb   :  { %v507_v41 = vpack.c.bf16 %v353_v33, %v352_v29  ;;  %v527_v42 = vpack.c.bf16 %v361_v34, %v360_v30  ;;  %v351_v43 = vmax.f32 %v335_v35, 0.0  ;;  %v359_v44 = vmax.f32 %v343_v36, 0.0 }
  0xec   :  { %v340_v45 = vadd.f32 %v584_v39, %v466_v16  ;;  %v348_v46 = vadd.f32 %v592_v40, %v466_v16  ;;  %v229_v47 = vpop.f32.mrf.mxu0  ;;  %v261_v48 = vpop.f32.mrf.mxu1 }
  0xed   :  { %539 = vst [vmem:[%s724_s3 + $0x8] sm:$0xff] %v507_v41   ;;  %543 = vst [vmem:[%s724_s3 + $0x28] sm:$0xff] %v527_v42   ;;  %v502_v49 = vpack.c.bf16 %v351_v43, %v350_v37  ;;  %v522_v50 = vpack.c.bf16 %v359_v44, %v358_v38  ;;  %v338_v51 = vadd.f32 %v466_v16, %v229_v47 }
  0xee   :  { %v346_v52 = vadd.f32 %v466_v16, %v261_v48  ;;  %v585_v53 = vpop.f32.mrf.mxu0  ;;  %v593_v54 = vpop.f32.mrf.mxu1  ;;  %v356_v57 = vmax.f32 %v340_v45, 0.0  ;;  %v364_v58 = vmax.f32 %v348_v46, 0.0 }
  0xef   :  { %503 = vst [vmem:[%s724_s3] sm:$0xff] %v502_v49   ;;  %542 = vst [vmem:[%s724_s3 + $0x20] sm:$0xff] %v522_v50   ;;  %v341_v55 = vadd.f32 %v585_v53, %v466_v16  ;;  %v349_v56 = vadd.f32 %v593_v54, %v466_v16  ;;  %v354_v1 = vmax.f32 %v338_v51, 0.0 }
  0xf0   :  { %v232_v59 = vpop.f32.mrf.mxu0  ;;  %v264_v60 = vpop.f32.mrf.mxu1  ;;  %v362_v2 = vmax.f32 %v346_v52, 0.0 }
  0xf1   :  { %v357_v61 = vmax.f32 %v341_v55, 0.0  ;;  %v365_v62 = vmax.f32 %v349_v56, 0.0  ;;  %v339_v63 = vadd.f32 %v466_v16, %v232_v59  ;;  %v347_v0 = vadd.f32 %v466_v16, %v264_v60 }
  0xf3   :  { %v517_v3 = vpack.c.bf16 %v357_v61, %v356_v57  ;;  %v537_v4 = vpack.c.bf16 %v365_v62, %v364_v58  ;;  %v355_v5 = vmax.f32 %v339_v63, 0.0  ;;  %v363_v6 = vmax.f32 %v347_v0, 0.0 }
  0xf5   :  { %541 = vst [vmem:[%s724_s3 + $0x18] sm:$0xff] %v517_v3   ;;  %545 = vst [vmem:[%s724_s3 + $0x38] sm:$0xff] %v537_v4   ;;  %v512_v7 = vpack.c.bf16 %v355_v5, %v354_v1  ;;  %v532_v8 = vpack.c.bf16 %v363_v6, %v362_v2 }
  0xf7   :  { %540 = vst [vmem:[%s724_s3 + $0x10] sm:$0xff] %v512_v7   ;;  %544 = vst [vmem:[%s724_s3 + $0x30] sm:$0xff] %v532_v8  }

// kernel: custom_gnn_forward.7
= control target key start
LH: loop header
LB: loop body
LE: loop exit
PB: predicated region body
PF: predicated region fallthrough
CT: control target
= control target key end

     0   :  { %v350_v16 = vlaneseq  ;;  %s940_s1 = inlined_call_operand.vmem [shape: bf16[128,128], index: 1, kind: input, shape index: {}]   ;;  %s941_s0 = inlined_call_operand.vmem [shape: bf16[128,128], index: 0, kind: input, shape index: {}]   ;;  %s942_s2 = inlined_call_operand.vmem [shape: f32[1,128], index: 2, kind: input, shape index: {}]   ;;  %s943_s3 = inlined_call_operand.vmem [shape: f32[128,128], index: 3, kind: output, shape index: {}]  }
   0x1   :  { %v630_v0 = vld [vmem:[%s940_s1 + $0x38] sm:$0xff]   ;;  %v631_v1 = vld [vmem:[%s940_s1 + $0x30] sm:$0xff]   ;;  %v632_v2 = vld [vmem:[%s940_s1 + $0x28] sm:$0xff]  }
   0x2   :  { %582 = vmatprep.subr.bf16.mxu0 %v630_v0  ;;  %614 = vmatprep.subr.bf16.mxu1 %v630_v0  ;;  %v633_v3 = vld [vmem:[%s940_s1 + $0x20] sm:$0xff]   ;;  %v634_v6 = vld [vmem:[%s940_s1 + $0x18] sm:$0xff]   ;;  %v635_v7 = vld [vmem:[%s940_s1 + $0x10] sm:$0xff]   ;;  %v778_v17 = vand.u32 127, %v350_v16 }
   0x3   :  { %583 = vmatpush3.bf16.msra.mxu0 %v630_v0  ;;  %622 = vmatpush3.bf16.msra.mxu1 %v630_v0  ;;  %v638_v4 = vld [vmem:[%s941_s0] sm:$0xff]   ;;  %v636_v8 = vld [vmem:[%s940_s1 + $0x8] sm:$0xff]   ;;  %v642_v12 = vld [vmem:[%s941_s0 + $0x10] sm:$0xff]  }
   0x4   :  { %584 = vmatprep.subr.bf16.mxu0 %v631_v1  ;;  %615 = vmatprep.subr.bf16.mxu1 %v631_v1  ;;  %v639_v5 = vld [vmem:[%s941_s0 + $0x20] sm:$0xff]   ;;  %v640_v10 = vld [vmem:[%s941_s0 + $0x8] sm:$0xff]   ;;  %v644_v13 = vld [vmem:[%s941_s0 + $0x30] sm:$0xff]   ;;  %vm352_vm0 = vcmp.lt.s32.totalorder %v778_v17, 8 }
   0x5   :  { %598 = vmatprep.mubr.bf16.mxu0 %v638_v4  ;;  %606 = vmatprep.mubr.bf16.mxu1 %v639_v5  ;;  %v637_v9 = vld [vmem:[%s940_s1] sm:$0xff]   ;;  %v641_v11 = vld [vmem:[%s941_s0 + $0x28] sm:$0xff]   ;;  %v643_v14 = vld [vmem:[%s941_s0 + $0x18] sm:$0xff]  }
   0x6   :  { %v645_v15 = vld [vmem:[%s941_s0 + $0x38] sm:$0xff]   ;;  %v565_v18 = vld [vmem:[%s942_s2] ss:$0 sm:$0xff] }
   0x7   :  { %585 = vmatpush3.bf16.msra.mxu0 %v631_v1  ;;  %623 = vmatpush3.bf16.msra.mxu1 %v631_v1 }
   0x8   :  { %586 = vmatprep.subr.bf16.mxu0 %v632_v2  ;;  %616 = vmatprep.subr.bf16.mxu1 %v632_v2 }
   0xb   :  { %587 = vmatpush3.bf16.msra.mxu0 %v632_v2  ;;  %624 = vmatpush3.bf16.msra.mxu1 %v632_v2 }
   0xc   :  { %588 = vmatprep.subr.bf16.mxu0 %v633_v3  ;;  %617 = vmatprep.subr.bf16.mxu1 %v633_v3 }
   0xf   :  { %589 = vmatpush3.bf16.msra.mxu0 %v633_v3  ;;  %625 = vmatpush3.bf16.msra.mxu1 %v633_v3 }
  0x10   :  { %590 = vmatprep.subr.bf16.mxu0 %v634_v6  ;;  %618 = vmatprep.subr.bf16.mxu1 %v634_v6 }
  0x13   :  { %591 = vmatpush3.bf16.msra.mxu0 %v634_v6  ;;  %626 = vmatpush3.bf16.msra.mxu1 %v634_v6 }
  0x14   :  { %592 = vmatprep.subr.bf16.mxu0 %v635_v7  ;;  %619 = vmatprep.subr.bf16.mxu1 %v635_v7 }
  0x17   :  { %593 = vmatpush3.bf16.msra.mxu0 %v635_v7  ;;  %627 = vmatpush3.bf16.msra.mxu1 %v635_v7 }
  0x18   :  { %594 = vmatprep.subr.bf16.mxu0 %v636_v8  ;;  %620 = vmatprep.subr.bf16.mxu1 %v636_v8 }
  0x1b   :  { %595 = vmatpush3.bf16.msra.mxu0 %v636_v8  ;;  %628 = vmatpush3.bf16.msra.mxu1 %v636_v8 }
  0x1c   :  { %596 = vmatprep.subr.bf16.mxu0 %v637_v9  ;;  %621 = vmatprep.subr.bf16.mxu1 %v637_v9 }
  0x1f   :  { %597 = vmatpush3.bf16.msra.mxu0 %v637_v9  ;;  %629 = vmatpush3.bf16.msra.mxu1 %v637_v9 }
  0x22   :  { %599 = vmatmul.mubr.bf16.vlgmr.msra.gmra.mxu0 %v640_v10  ;;  %607 = vmatmul.mubr.bf16.vlgmr.msra.gmra.mxu1 %v641_v11 }
  0x23   :  { %602 = vmatprep.mubr.bf16.mxu0 %v642_v12  ;;  %610 = vmatprep.mubr.bf16.mxu1 %v644_v13 }
  0x2a   :  { %603 = vmatmul.mubr.bf16.gmra.mxu0 %v643_v14  ;;  %611 = vmatmul.mubr.bf16.gmra.mxu1 %v645_v15 }
  0xe2   :  { %v600_v19 = vpop.f32.mrf.mxu0  ;;  %v608_v20 = vpop.f32.mrf.mxu1 }
  0xe3   :  { %v336_v21 = vadd.f32 %v600_v19, %v565_v18  ;;  %v344_v22 = vadd.f32 %v608_v20, %v565_v18 }
  0xe4   :  { %v213_v23 = vpop.f32.mrf.mxu0  ;;  %v245_v24 = vpop.f32.mrf.mxu1 }
  0xe5   :  { %v334_v25 = vadd.f32 %v565_v18, %v213_v23  ;;  %v363_v26 = vsel %vm352_vm0, %v344_v22, -1e+30  ;;  %v355_v27 = vsel %vm352_vm0, %v336_v21, -1e+30  ;;  %v342_v33 = vadd.f32 %v565_v18, %v245_v24 }
  0xe6   :  { %389 = vmax.xlane.f32.xlu0 %v363_v26  ;;  %v609_v28 = vpop.f32.mrf.mxu1  ;;  %373 = vmax.xlane.f32.xlu1 %v355_v27  ;;  %v601_v29 = vpop.f32.mrf.mxu0 }
  0xe7   :  { %v337_v30 = vadd.f32 %v601_v29, %v565_v18  ;;  %v345_v34 = vadd.f32 %v609_v28, %v565_v18  ;;  %v353_v35 = vsel %vm352_vm0, %v334_v25, -1e+30  ;;  %v361_v42 = vsel %vm352_vm0, %v342_v33, -1e+30 }
  0xe8   :  { %v216_v31 = vpop.f32.mrf.mxu0  ;;  %v248_v32 = vpop.f32.mrf.mxu1 }
  0xe9   :  { %v356_v36 = vsel %vm352_vm0, %v337_v30, -1e+30  ;;  %v335_v40 = vadd.f32 %v565_v18, %v216_v31  ;;  %v343_v41 = vadd.f32 %v565_v18, %v248_v32  ;;  %v364_v43 = vsel %vm352_vm0, %v345_v34, -1e+30 }
  0xea   :  { %369 = vmax.xlane.f32.xlu0 %v353_v35  ;;  %375 = vmax.xlane.f32.xlu1 %v356_v36  ;;  %v604_v37 = vpop.f32.mrf.mxu0  ;;  %v612_v38 = vpop.f32.mrf.mxu1 }
  0xeb   :  { %v340_v46 = vadd.f32 %v604_v37, %v565_v18  ;;  %v362_v48 = vsel %vm352_vm0, %v343_v41, -1e+30  ;;  %v354_v49 = vsel %vm352_vm0, %v335_v40, -1e+30  ;;  %v348_v61 = vadd.f32 %v612_v38, %v565_v18 }
  0xec   :  { %v229_v39 = vpop.f32.mrf.mxu0  ;;  %v261_v45 = vpop.f32.mrf.mxu1 }
  0xed   :  { %v359_v52 = vsel %vm352_vm0, %v340_v46, -1e+30  ;;  %v338_v54 = vadd.f32 %v565_v18, %v229_v39  ;;  %v346_v57 = vadd.f32 %v565_v18, %v261_v45  ;;  %v817_v1 = vsel %vm352_vm0, %v348_v61, -1e+30 }
  0xee   :  { %385 = vmax.xlane.f32.xlu0 %v361_v42  ;;  %391 = vmax.xlane.f32.xlu1 %v364_v43  ;;  %v605_v44 = vpop.f32.mrf.mxu0  ;;  %v613_v51 = vpop.f32.mrf.mxu1 }
  0xef   :  { %v341_v47 = vadd.f32 %v605_v44, %v565_v18  ;;  %v357_v59 = vsel %vm352_vm0, %v338_v54, -1e+30  ;;  %v349_v62 = vadd.f32 %v613_v51, %v565_v18  ;;  %v365_v63 = vsel %vm352_vm0, %v346_v57, -1e+30 }
  0xf0   :  { %v232_v50 = vpop.f32.mrf.mxu0  ;;  %v264_v56 = vpop.f32.mrf.mxu1 }
  0xf1   :  { %v360_v53 = vsel %vm352_vm0, %v341_v47, -1e+30  ;;  %v339_v55 = vadd.f32 %v565_v18, %v232_v50  ;;  %v347_v58 = vadd.f32 %v565_v18, %v264_v56  ;;  %v821_v2 = vsel %vm352_vm0, %v349_v62, -1e+30 }
  0xf2   :  { %387 = vmax.xlane.f32.xlu1 %v362_v48  ;;  %371 = vmax.xlane.f32.xlu0 %v354_v49 }
  0xf3   :  { %v358_v60 = vsel %vm352_vm0, %v339_v55, -1e+30  ;;  %v812_v0 = vsel %vm352_vm0, %v347_v58, -1e+30 }
  0xf6   :  { %381 = vmax.xlane.f32.xlu0 %v359_v52  ;;  %383 = vmax.xlane.f32.xlu1 %v360_v53 }
  0xfa   :  { %377 = vmax.xlane.f32.xlu0 %v357_v59  ;;  %379 = vmax.xlane.f32.xlu1 %v358_v60 }
  0xfe   :  { %393 = vmax.xlane.f32.xlu0 %v365_v63  ;;  %395 = vmax.xlane.f32.xlu1 %v812_v0 }
 0x102   :  { %397 = vmax.xlane.f32.xlu0 %v817_v1  ;;  %399 = vmax.xlane.f32.xlu1 %v821_v2 }
 0x16f   :  { %v390_v3 = vpop.xlane.xlu0 %389  ;;  %v374_v4 = vpop.xlane.xlu1 %373 }
 0x170   :  { %v825_v5 = vsub.f32 %v363_v26, %v390_v3  ;;  %v827_v6 = vsub.f32 %v355_v27, %v374_v4 }
 0x172   :  { %v421_v7 = vmul.f32 1.442695, %v827_v6  ;;  %v437_v10 = vmul.f32 1.442695, %v825_v5 }
 0x173   :  { %v370_v8 = vpop.xlane.xlu0 %369  ;;  %v376_v9 = vpop.xlane.xlu1 %375 }
 0x174   :  { %v831_v11 = vsub.f32 %v353_v35, %v370_v8  ;;  %v833_v12 = vsub.f32 %v356_v36, %v376_v9  ;;  %646 = vpow2.f32 %v421_v7 }
 0x175   :  { %648 = vpow2.f32 %v437_v10 }
 0x176   :  { %v423_v13 = vmul.f32 1.442695, %v833_v12  ;;  %v417_v16 = vmul.f32 1.442695, %v831_v11 }
 0x177   :  { %v386_v14 = vpop.xlane.xlu0 %385  ;;  %v392_v15 = vpop.xlane.xlu1 %391 }
 0x178   :  { %v837_v17 = vsub.f32 %v361_v42, %v386_v14  ;;  %v839_v18 = vsub.f32 %v364_v43, %v392_v15  ;;  %650 = vpow2.f32 %v423_v13 }
 0x179   :  { %652 = vpow2.f32 %v417_v16 }
 0x17a   :  { %v439_v19 = vmul.f32 1.442695, %v839_v18  ;;  %v433_v22 = vmul.f32 1.442695, %v837_v17 }
 0x17b   :  { %v388_v20 = vpop.xlane.xlu1 %387  ;;  %v372_v21 = vpop.xlane.xlu0 %371 }
 0x17c   :  { %v843_v23 = vsub.f32 %v354_v49, %v372_v21  ;;  %654 = vpow2.f32 %v439_v19  ;;  %v845_v24 = vsub.f32 %v362_v48, %v388_v20 }
 0x17d   :  { %656 = vpow2.f32 %v433_v22 }
 0x17e   :  { %v419_v25 = vmul.f32 1.442695, %v843_v23  ;;  %v435_v29 = vmul.f32 1.442695, %v845_v24 }
 0x17f   :  { %v382_v26 = vpop.xlane.xlu0 %381  ;;  %v384_v27 = vpop.xlane.xlu1 %383 }
 0x180   :  { %v848_v28 = vsub.f32 %v359_v52, %v382_v26  ;;  %658 = vpow2.f32 %v419_v25  ;;  %v851_v30 = vsub.f32 %v360_v53, %v384_v27 }
 0x181   :  { %v647_v31 = vpop.eup %646 }
 0x182   :  { %v429_v32 = vmul.f32 1.442695, %v848_v28  ;;  %453 = vadd.xlane.f32.xlu0 %v647_v31  ;;  %v649_v36 = vpop.eup %648  ;;  %v431_v37 = vmul.f32 1.442695, %v851_v30 }
 0x183   :  { %v378_v33 = vpop.xlane.xlu0 %377  ;;  %v380_v34 = vpop.xlane.xlu1 %379 }
 0x184   :  { %660 = vpow2.f32 %v429_v32  ;;  %v854_v35 = vsub.f32 %v357_v59, %v378_v33  ;;  %v857_v38 = vsub.f32 %v358_v60, %v380_v34 }
 0x185   :  { %662 = vpow2.f32 %v435_v29  ;;  %v651_v39 = vpop.eup %650 }
 0x186   :  { %v425_v40 = vmul.f32 1.442695, %v854_v35  ;;  %469 = vadd.xlane.f32.xlu0 %v649_v36  ;;  %455 = vadd.xlane.f32.xlu1 %v651_v39  ;;  %v653_v44 = vpop.eup %652  ;;  %v427_v45 = vmul.f32 1.442695, %v857_v38 }
 0x187   :  { %v394_v41 = vpop.xlane.xlu0 %393  ;;  %v396_v42 = vpop.xlane.xlu1 %395 }
 0x188   :  { %664 = vpow2.f32 %v425_v40  ;;  %v860_v43 = vsub.f32 %v365_v63, %v394_v41  ;;  %v864_v46 = vsub.f32 %v812_v0, %v396_v42 }
 0x189   :  { %666 = vpow2.f32 %v431_v37  ;;  %v655_v47 = vpop.eup %654 }
 0x18a   :  { %v441_v48 = vmul.f32 1.442695, %v860_v43  ;;  %449 = vadd.xlane.f32.xlu0 %v653_v44  ;;  %471 = vadd.xlane.f32.xlu1 %v655_v47  ;;  %v657_v52 = vpop.eup %656  ;;  %v443_v53 = vmul.f32 1.442695, %v864_v46 }
 0x18b   :  { %v398_v49 = vpop.xlane.xlu0 %397  ;;  %v400_v50 = vpop.xlane.xlu1 %399 }
 0x18c   :  { %668 = vpow2.f32 %v441_v48  ;;  %v868_v51 = vsub.f32 %v817_v1, %v398_v49  ;;  %v872_v54 = vsub.f32 %v821_v2, %v400_v50 }
 0x18d   :  { %670 = vpow2.f32 %v427_v45  ;;  %v659_v55 = vpop.eup %658 }
 0x18e   :  { %v445_v56 = vmul.f32 1.442695, %v868_v51  ;;  %465 = vadd.xlane.f32.xlu0 %v657_v52  ;;  %451 = vadd.xlane.f32.xlu1 %v659_v55  ;;  %v447_v58 = vmul.f32 1.442695, %v872_v54 }
 0x190   :  { %672 = vpow2.f32 %v445_v56 }
 0x191   :  { %v661_v57 = vpop.eup %660  ;;  %674 = vpow2.f32 %v443_v53 }
 0x192   :  { %v663_v59 = vpop.eup %662  ;;  %461 = vadd.xlane.f32.xlu0 %v661_v57  ;;  %676 = vpow2.f32 %v447_v58 }
 0x193   :  { %467 = vadd.xlane.f32.xlu1 %v663_v59 }
 0x195   :  { %v665_v60 = vpop.eup %664 }
 0x196   :  { %v667_v61 = vpop.eup %666  ;;  %457 = vadd.xlane.f32.xlu0 %v665_v60 }
 0x197   :  { %463 = vadd.xlane.f32.xlu1 %v667_v61 }
 0x199   :  { %v669_v62 = vpop.eup %668 }
 0x19a   :  { %v671_v63 = vpop.eup %670  ;;  %473 = vadd.xlane.f32.xlu0 %v669_v62 }
 0x19b   :  { %459 = vadd.xlane.f32.xlu1 %v671_v63 }
 0x19d   :  { %v673_v0 = vpop.eup %672 }
 0x19e   :  { %v675_v1 = vpop.eup %674  ;;  %477 = vadd.xlane.f32.xlu0 %v673_v0 }
 0x19f   :  { %475 = vadd.xlane.f32.xlu1 %v675_v1  ;;  %v677_v2 = vpop.eup %676 }
 0x1a3   :  { %479 = vadd.xlane.f32.xlu1 %v677_v2 }
 0x20b   :  { %v454_v3 = vpop.xlane.xlu0 %453 }
 0x20c   :  { %678 = vlog2.f32 %v454_v3 }
 0x20f   :  { %v470_v4 = vpop.xlane.xlu0 %469  ;;  %v456_v7 = vpop.xlane.xlu1 %455 }
 0x210   :  { %680 = vlog2.f32 %v470_v4 }
 0x211   :  { %682 = vlog2.f32 %v456_v7 }
 0x213   :  { %v450_v8 = vpop.xlane.xlu0 %449  ;;  %v472_v9 = vpop.xlane.xlu1 %471 }
 0x214   :  { %684 = vlog2.f32 %v450_v8 }
 0x215   :  { %686 = vlog2.f32 %v472_v9 }
 0x217   :  { %v466_v10 = vpop.xlane.xlu0 %465  ;;  %v452_v13 = vpop.xlane.xlu1 %451 }
 0x218   :  { %688 = vlog2.f32 %v466_v10 }
 0x219   :  { %v679_v14 = vpop.eup %678  ;;  %690 = vlog2.f32 %v452_v13 }
 0x21a   :  { %v486_v15 = vmul.f32 0.6931472, %v679_v14 }
 0x21b   :  { %v462_v16 = vpop.xlane.xlu0 %461 }
 0x21c   :  { %v468_v19 = vpop.xlane.xlu1 %467  ;;  %v515_v20 = vsub.f32 %v827_v6, %v486_v15  ;;  %692 = vlog2.f32 %v462_v16 }
 0x21d   :  { %v681_v21 = vpop.eup %680  ;;  %694 = vlog2.f32 %v468_v19 }
 0x21e   :  { %v683_v22 = vpop.eup %682  ;;  %531 = vst [vmem:[%s943_s3 + $0x10] sm:$0xff] %v515_v20  ;;  %v502_v25 = vmul.f32 0.6931472, %v681_v21 }
 0x21f   :  { %v488_v26 = vmul.f32 0.6931472, %v683_v22  ;;  %v458_v27 = vpop.xlane.xlu0 %457 }
 0x220   :  { %v464_v29 = vpop.xlane.xlu1 %463  ;;  %v523_v31 = vsub.f32 %v825_v5, %v502_v25  ;;  %696 = vlog2.f32 %v458_v27 }
 0x221   :  { %v685_v32 = vpop.eup %684  ;;  %v516_v33 = vsub.f32 %v833_v12, %v488_v26  ;;  %698 = vlog2.f32 %v464_v29 }
 0x222   :  { %v687_v6 = vpop.eup %686  ;;  %539 = vst [vmem:[%s943_s3 + $0x50] sm:$0xff] %v523_v31  ;;  %v482_v34 = vmul.f32 0.6931472, %v685_v32 }
 0x223   :  { %532 = vst [vmem:[%s943_s3 + $0x18] sm:$0xff] %v516_v33  ;;  %v504_v36 = vmul.f32 0.6931472, %v687_v6  ;;  %v474_v37 = vpop.xlane.xlu0 %473 }
 0x224   :  { %v460_v39 = vpop.xlane.xlu1 %459  ;;  %v513_v5 = vsub.f32 %v831_v11, %v482_v34  ;;  %700 = vlog2.f32 %v474_v37 }
 0x225   :  { %v689_v40 = vpop.eup %688  ;;  %v524_v12 = vsub.f32 %v839_v18, %v504_v36  ;;  %702 = vlog2.f32 %v460_v39 }
 0x226   :  { %v691_v41 = vpop.eup %690  ;;  %529 = vst [vmem:[%s943_s3] sm:$0xff] %v513_v5  ;;  %v498_v42 = vmul.f32 0.6931472, %v689_v40 }
 0x227   :  { %540 = vst [vmem:[%s943_s3 + $0x58] sm:$0xff] %v524_v12  ;;  %v484_v44 = vmul.f32 0.6931472, %v691_v41  ;;  %v478_v45 = vpop.xlane.xlu0 %477 }
 0x228   :  { %v476_v47 = vpop.xlane.xlu1 %475  ;;  %v521_v11 = vsub.f32 %v837_v17, %v498_v42  ;;  %704 = vlog2.f32 %v478_v45 }
 0x229   :  { %v693_v48 = vpop.eup %692  ;;  %v514_v18 = vsub.f32 %v843_v23, %v484_v44  ;;  %706 = vlog2.f32 %v476_v47 }
 0x22a   :  { %v695_v49 = vpop.eup %694  ;;  %537 = vst [vmem:[%s943_s3 + $0x40] sm:$0xff] %v521_v11  ;;  %v494_v50 = vmul.f32 0.6931472, %v693_v48 }
 0x22b   :  { %530 = vst [vmem:[%s943_s3 + $0x8] sm:$0xff] %v514_v18  ;;  %v500_v52 = vmul.f32 0.6931472, %v695_v49 }
 0x22c   :  { %v480_v53 = vpop.xlane.xlu1 %479  ;;  %v519_v55 = vsub.f32 %v848_v28, %v494_v50 }
 0x22d   :  { %708 = vlog2.f32 %v480_v53  ;;  %v697_v17 = vpop.eup %696  ;;  %v522_v56 = vsub.f32 %v845_v24, %v500_v52 }
 0x22e   :  { %v699_v23 = vpop.eup %698  ;;  %535 = vst [vmem:[%s943_s3 + $0x30] sm:$0xff] %v519_v55  ;;  %v490_v57 = vmul.f32 0.6931472, %v697_v17 }
 0x22f   :  { %538 = vst [vmem:[%s943_s3 + $0x48] sm:$0xff] %v522_v56  ;;  %v496_v58 = vmul.f32 0.6931472, %v699_v23 }
 0x230   :  { %v517_v59 = vsub.f32 %v854_v35, %v490_v57 }
 0x231   :  { %v701_v60 = vpop.eup %700  ;;  %v520_v28 = vsub.f32 %v851_v30, %v496_v58 }
 0x232   :  { %v703_v61 = vpop.eup %702  ;;  %533 = vst [vmem:[%s943_s3 + $0x20] sm:$0xff] %v517_v59  ;;  %v506_v24 = vmul.f32 0.6931472, %v701_v60 }
 0x233   :  { %536 = vst [vmem:[%s943_s3 + $0x38] sm:$0xff] %v520_v28  ;;  %v492_v62 = vmul.f32 0.6931472, %v703_v61 }
 0x234   :  { %v525_v63 = vsub.f32 %v860_v43, %v506_v24 }
 0x235   :  { %v705_v0 = vpop.eup %704  ;;  %v518_v1 = vsub.f32 %v857_v38, %v492_v62 }
 0x236   :  { %v707_v35 = vpop.eup %706  ;;  %541 = vst [vmem:[%s943_s3 + $0x60] sm:$0xff] %v525_v63  ;;  %v510_v30 = vmul.f32 0.6931472, %v705_v0 }
 0x237   :  { %534 = vst [vmem:[%s943_s3 + $0x28] sm:$0xff] %v518_v1  ;;  %v508_v2 = vmul.f32 0.6931472, %v707_v35 }
 0x238   :  { %v527_v3 = vsub.f32 %v868_v51, %v510_v30 }
 0x239   :  { %v526_v7 = vsub.f32 %v864_v46, %v508_v2 }
 0x23a   :  { %v709_v4 = vpop.eup %708  ;;  %543 = vst [vmem:[%s943_s3 + $0x70] sm:$0xff] %v527_v3 }
 0x23b   :  { %v512_v38 = vmul.f32 0.6931472, %v709_v4  ;;  %542 = vst [vmem:[%s943_s3 + $0x68] sm:$0xff] %v526_v7 }
 0x23d   :  { %v528_v43 = vsub.f32 %v872_v54, %v512_v38 }
 0x23f   :  { %544 = vst [vmem:[%s943_s3 + $0x78] sm:$0xff] %v528_v43 }

</bundles_post_ra>
